<compile_context>
chip_gen: v7x
topology: tpu7x:2x2x1
jax: 0.10.0
libtpu: 0.0.40
codegen_flags: <defaults>
</compile_context>

<pallas_src>
import functools

import jax
import jax.numpy as jnp
from jax.experimental import pallas as pl
from jax.experimental.pallas import tpu as pltpu


# ---------------------------------------------------------------------------
# helpers
# ---------------------------------------------------------------------------
def _pick_row_tile(m, cap=512):
    """Largest row tile <= cap that evenly divides m (prefer multiples of 8)."""
    if m <= cap:
        return m
    for t in range(cap - cap % 8, 7, -8):
        if m % t == 0:
            return t
    for t in range(cap, 0, -1):
        if m % t == 0:
            return t
    return m


_PARALLEL_1D = pltpu.CompilerParams(dimension_semantics=("parallel",))


def _layernorm_f32(x, g, b, eps):
    mu = jnp.mean(x, axis=-1, keepdims=True)
    xc = x - mu
    var = jnp.mean(xc * xc, axis=-1, keepdims=True)
    return xc * jax.lax.rsqrt(var + eps) * g + b


# ---------------------------------------------------------------------------
# Fused attention sub-block kernel (one batch element per grid step):
#   LN -> SE (mean over seq, 2 FCs, sigmoid gate) -> per-head QKV -> softmax
#   attention -> output projection -> +bias -> +residual
# ---------------------------------------------------------------------------
def _attn_block_kernel(h_ref, g_ref, b_ref, sw1_ref, sw2_ref,
                       wq_ref, wk_ref, wv_ref, wo_ref, bo_ref,
                       o_ref, *, scale, eps):
    x = h_ref[0].astype(jnp.float32)                               # (N, D)
    # LayerNorm
    y = _layernorm_f32(x, g_ref[...].astype(jnp.float32),
                       b_ref[...].astype(jnp.float32), eps)
    # Squeeze-Excite over the sequence axis
    pooled = jnp.mean(y, axis=0, keepdims=True)                    # (1, D)
    se_h = jnp.maximum(
        jnp.dot(pooled, sw1_ref[...], preferred_element_type=jnp.float32), 0.0)
    s = jax.nn.sigmoid(
        jnp.dot(se_h, sw2_ref[...], preferred_element_type=jnp.float32))
    y = y * s                                                      # (N, D)

    # Multi-head attention, static unroll over heads; all intermediates in VMEM.
    heads = wq_ref.shape[0]
    acc = jnp.zeros_like(x)                                        # (N, D)
    for hh in range(heads):
        q = jnp.dot(y, wq_ref[hh], preferred_element_type=jnp.float32)   # (N, dh)
        k = jnp.dot(y, wk_ref[hh], preferred_element_type=jnp.float32)
        v = jnp.dot(y, wv_ref[hh], preferred_element_type=jnp.float32)
        dots = jax.lax.dot_general(
            q, k, dimension_numbers=(((1,), (1,)), ((), ())),
            preferred_element_type=jnp.float32) * scale                  # (N, N)
        mx = jnp.max(dots, axis=-1, keepdims=True)
        e = jnp.exp(dots - mx)
        attn = e * pl.reciprocal(jnp.sum(e, axis=-1, keepdims=True), approx=True)
        ctx = jnp.dot(attn, v, preferred_element_type=jnp.float32)       # (N, dh)
        acc = acc + jnp.dot(ctx, wo_ref[hh],
                            preferred_element_type=jnp.float32)          # (N, D)

    out = x + acc + bo_ref[...].astype(jnp.float32)
    o_ref[0] = out.astype(o_ref.dtype)


def attention_block(h, g1, b1, sw1, sw2, wq, wk, wv, wo, bo, *, scale, eps=1e-6):
    b, n, d = h.shape
    heads, _, dh = wq.shape
    dr = sw1.shape[1]
    return pl.pallas_call(
        functools.partial(_attn_block_kernel, scale=scale, eps=eps),
        out_shape=jax.ShapeDtypeStruct((b, n, d), h.dtype),
        grid=(b,),
        in_specs=[
            pl.BlockSpec((1, n, d), lambda i: (i, 0, 0)),          # residual input
            pl.BlockSpec((1, d), lambda i: (0, 0)),                # ln1 gamma
            pl.BlockSpec((1, d), lambda i: (0, 0)),                # ln1 beta
            pl.BlockSpec((d, dr), lambda i: (0, 0)),               # se fc1
            pl.BlockSpec((dr, d), lambda i: (0, 0)),               # se fc2
            pl.BlockSpec((heads, d, dh), lambda i: (0, 0, 0)),     # Wq (per head)
            pl.BlockSpec((heads, d, dh), lambda i: (0, 0, 0)),     # Wk
            pl.BlockSpec((heads, d, dh), lambda i: (0, 0, 0)),     # Wv
            pl.BlockSpec((heads, dh, d), lambda i: (0, 0, 0)),     # Wout (per head)
            pl.BlockSpec((1, d), lambda i: (0, 0)),                # out bias
        ],
        out_specs=pl.BlockSpec((1, n, d), lambda i: (i, 0, 0)),
        compiler_params=_PARALLEL_1D,
    )(h, g1, b1, sw1, sw2, wq, wk, wv, wo, bo)


# ---------------------------------------------------------------------------
# Fused MLP sub-block kernel (rows tiled over B*N):
#   LN -> fc1 -> GELU -> fc2 -> +residual
# ---------------------------------------------------------------------------
def _mlp_block_kernel(x_ref, g_ref, b_ref, w1_ref, b1_ref, w2_ref, b2_ref,
                      o_ref, *, eps):
    x = x_ref[...].astype(jnp.float32)                             # (TM, D)
    y = _layernorm_f32(x, g_ref[...].astype(jnp.float32),
                       b_ref[...].astype(jnp.float32), eps)
    hmid = jnp.dot(y, w1_ref[...], preferred_element_type=jnp.float32)
    hmid = hmid + b1_ref[...].astype(jnp.float32)
    hmid = jax.nn.gelu(hmid, approximate=True)
    y2 = jnp.dot(hmid, w2_ref[...], preferred_element_type=jnp.float32)
    y2 = y2 + b2_ref[...].astype(jnp.float32)
    o_ref[...] = (x + y2).astype(o_ref.dtype)


def mlp_block(h, g, bta, w1, b1, w2, b2, eps=1e-6):
    b, n, d = h.shape
    m = b * n
    mlp = w1.shape[1]
    x2 = h.reshape(m, d)
    tm = _pick_row_tile(m)
    out = pl.pallas_call(
        functools.partial(_mlp_block_kernel, eps=eps),
        out_shape=jax.ShapeDtypeStruct((m, d), h.dtype),
        grid=(m // tm,),
        in_specs=[
            pl.BlockSpec((tm, d), lambda i: (i, 0)),
            pl.BlockSpec((1, d), lambda i: (0, 0)),
            pl.BlockSpec((1, d), lambda i: (0, 0)),
            pl.BlockSpec((d, mlp), lambda i: (0, 0)),
            pl.BlockSpec((1, mlp), lambda i: (0, 0)),
            pl.BlockSpec((mlp, d), lambda i: (0, 0)),
            pl.BlockSpec((1, d), lambda i: (0, 0)),
        ],
        out_specs=pl.BlockSpec((tm, d), lambda i: (i, 0)),
        compiler_params=_PARALLEL_1D,
    )(x2, g, bta, w1, b1, w2, b2)
    return out.reshape(b, n, d)


# ---------------------------------------------------------------------------
# Final LayerNorm kernel (rows tiled over B*N)
# ---------------------------------------------------------------------------
def _layernorm_kernel(x_ref, g_ref, b_ref, o_ref, *, eps):
    x = x_ref[...].astype(jnp.float32)
    y = _layernorm_f32(x, g_ref[...].astype(jnp.float32),
                       b_ref[...].astype(jnp.float32), eps)
    o_ref[...] = y.astype(o_ref.dtype)


def layernorm(x2d, gamma, beta, eps=1e-6):
    m, d = x2d.shape
    tm = _pick_row_tile(m)
    return pl.pallas_call(
        functools.partial(_layernorm_kernel, eps=eps),
        out_shape=jax.ShapeDtypeStruct((m, d), x2d.dtype),
        grid=(m // tm,),
        in_specs=[
            pl.BlockSpec((tm, d), lambda i: (i, 0)),
            pl.BlockSpec((1, d), lambda i: (0, 0)),
            pl.BlockSpec((1, d), lambda i: (0, 0)),
        ],
        out_specs=pl.BlockSpec((tm, d), lambda i: (i, 0)),
        compiler_params=_PARALLEL_1D,
    )(x2d, gamma, beta)


# ---------------------------------------------------------------------------
# Encoder forward (two fused Pallas kernels per layer + one final LN kernel)
# ---------------------------------------------------------------------------
def encoder_forward(x, params, heads, dim_head):
    b, n, d = x.shape
    inner = heads * dim_head
    scale = float(d) ** -0.5
    h = x
    for lp in params["layers"]:
        # pre-reshape weights into per-head stacks (cheap one-time XLA reshape)
        w_qkv = lp["w_qkv"]
        wq = w_qkv[:, 0 * inner:1 * inner].reshape(d, heads, dim_head).transpose(1, 0, 2)
        wk = w_qkv[:, 1 * inner:2 * inner].reshape(d, heads, dim_head).transpose(1, 0, 2)
        wv = w_qkv[:, 2 * inner:3 * inner].reshape(d, heads, dim_head).transpose(1, 0, 2)
        wo = lp["w_out"].reshape(heads, dim_head, d)
        # fused attention sub-block (LN + SE + MHA + out-proj + residual)
        h = attention_block(h, lp["ln1_g"], lp["ln1_b"], lp["se_w1"], lp["se_w2"],
                            wq, wk, wv, wo, lp["b_out"], scale=scale)
        # fused MLP sub-block (LN + fc1 + GELU + fc2 + residual)
        h = mlp_block(h, lp["ln2_g"], lp["ln2_b"], lp["w_fc1"], lp["b_fc1"],
                      lp["w_fc2"], lp["b_fc2"])
    encoded = layernorm(h.reshape(b * n, d), params["lnf_g"], params["lnf_b"])
    # The reference Encoder also returns attn_weights, which is always an empty list.
    return encoded.reshape(b, n, d)


# ---------------------------------------------------------------------------
# pure-JAX reference of the same forward
# ---------------------------------------------------------------------------
def reference_forward(x, params, heads, dim_head):
    b, n, d = x.shape
    inner = heads * dim_head
    scale = float(d) ** -0.5
    hp = jax.lax.Precision.HIGHEST

    def mm(a, bb):
        return jnp.matmul(a, bb, precision=hp)

    def ln(z, g, bta):
        zf = z.astype(jnp.float32)
        mu = jnp.mean(zf, axis=-1, keepdims=True)
        var = jnp.mean(jnp.square(zf - mu), axis=-1, keepdims=True)
        return (zf - mu) * jax.lax.rsqrt(var + 1e-6) * g.reshape(-1) + bta.reshape(-1)

    h = x.astype(jnp.float32)
    for lp in params["layers"]:
        res = h
        y = ln(h, lp["ln1_g"], lp["ln1_b"])
        pooled = jnp.mean(y, axis=1)                                        # (B, D)
        s = jax.nn.sigmoid(mm(jnp.maximum(mm(pooled, lp["se_w1"]), 0.0), lp["se_w2"]))
        y = y * s[:, None, :]
        qkv = mm(y, lp["w_qkv"])
        q, k, v = jnp.split(qkv, 3, axis=-1)
        split = lambda t: t.reshape(b, n, heads, dim_head).transpose(0, 2, 1, 3)
        q, k, v = map(split, (q, k, v))
        dots = jnp.einsum("bhid,bhjd->bhij", q, k, precision=hp) * scale
        attn = jax.nn.softmax(dots, axis=-1)
        o = jnp.einsum("bhij,bhjd->bhid", attn, v, precision=hp)
        o = o.transpose(0, 2, 1, 3).reshape(b, n, inner)
        o = mm(o, lp["w_out"]) + lp["b_out"].reshape(-1)
        h = res + o
        res = h
        y = ln(h, lp["ln2_g"], lp["ln2_b"])
        y = jax.nn.gelu(mm(y, lp["w_fc1"]) + lp["b_fc1"].reshape(-1), approximate=True)
        y = mm(y, lp["w_fc2"]) + lp["b_fc2"].reshape(-1)
        h = res + y
    return ln(h, params["lnf_g"], params["lnf_b"])


# ---------------------------------------------------------------------------
# deterministic parameter init (weights stored pre-transposed for x @ W)
# ---------------------------------------------------------------------------
def init_params(key, hidden, mlp_dim, num_layers, heads, dim_head, reduction=16):
    inner = heads * dim_head
    dr = max(hidden // reduction, 1)
    layers = []
    for _ in range(num_layers):
        key, *ks = jax.random.split(key, 13)
        layers.append(dict(
            ln1_g=1.0 + 0.1 * jax.random.normal(ks[0], (1, hidden), jnp.float32),
            ln1_b=0.05 * jax.random.normal(ks[1], (1, hidden), jnp.float32),
            se_w1=jax.random.normal(ks[2], (hidden, dr), jnp.float32) / jnp.sqrt(hidden),
            se_w2=jax.random.normal(ks[3], (dr, hidden), jnp.float32) / jnp.sqrt(dr),
            w_qkv=jax.random.normal(ks[4], (hidden, 3 * inner), jnp.float32) / jnp.sqrt(hidden),
            w_out=jax.random.normal(ks[5], (inner, hidden), jnp.float32) / jnp.sqrt(inner),
            b_out=1e-3 * jax.random.normal(ks[6], (1, hidden), jnp.float32),
            ln2_g=1.0 + 0.1 * jax.random.normal(ks[7], (1, hidden), jnp.float32),
            ln2_b=0.05 * jax.random.normal(ks[8], (1, hidden), jnp.float32),
            w_fc1=jax.random.normal(ks[9], (hidden, mlp_dim), jnp.float32) / jnp.sqrt(hidden),
            b_fc1=1e-3 * jax.random.normal(ks[10], (1, mlp_dim), jnp.float32),
            w_fc2=jax.random.normal(ks[11], (mlp_dim, hidden), jnp.float32) / jnp.sqrt(mlp_dim),
            b_fc2=jnp.zeros((1, hidden), jnp.float32),
        ))
    key, kg, kb = jax.random.split(key, 3)
    return dict(
        layers=layers,
        lnf_g=1.0 + 0.1 * jax.random.normal(kg, (1, hidden), jnp.float32),
        lnf_b=0.05 * jax.random.normal(kb, (1, hidden), jnp.float32),
    )


# ---------------------------------------------------------------------------
if __name__ == "__main__":
    key = jax.random.PRNGKey(0)
    B, N, D = 2, 8, 32          # batch, seq, hidden
    heads, dim_head = 4, 8      # inner_dim = 32
    mlp_dim, num_layers = 64, 2

    kx, kp = jax.random.split(key)
    x = jax.random.normal(kx, (B, N, D), dtype=jnp.float32)
    params = init_params(kp, D, mlp_dim, num_layers, heads, dim_head)

    y = encoder_forward(x, params, heads, dim_head)
    y = jax.block_until_ready(y)

    y_ref = reference_forward(x, params, heads, dim_head)
    assert y.shape == (B, N, D)
    err = float(jnp.max(jnp.abs(y.astype(jnp.float32) - y_ref.astype(jnp.float32))))
    assert err < 3e-3, f"mismatch vs reference: max abs err = {err}"

    print("KERNEL_OK")
</pallas_src>

<mosaic_0001>
module attributes {stable_mosaic.version = 11 : i64} {
  func.func @_attn_block_kernel(%arg0: i32, %arg1: memref<1x8x32xf32, #tpu.memory_space<vmem>>, %arg2: memref<1x32xf32, #tpu.memory_space<vmem>>, %arg3: memref<1x32xf32, #tpu.memory_space<vmem>>, %arg4: memref<32x2xf32, #tpu.memory_space<vmem>>, %arg5: memref<2x32xf32, #tpu.memory_space<vmem>>, %arg6: memref<4x32x8xf32, #tpu.memory_space<vmem>>, %arg7: memref<4x32x8xf32, #tpu.memory_space<vmem>>, %arg8: memref<4x32x8xf32, #tpu.memory_space<vmem>>, %arg9: memref<4x8x32xf32, #tpu.memory_space<vmem>>, %arg10: memref<1x32xf32, #tpu.memory_space<vmem>>, %arg11: memref<1x8x32xf32, #tpu.memory_space<vmem>>) attributes {dimension_semantics = [#tpu.dimension_semantics<parallel>], iteration_bounds = array<i64: 2>, scalar_prefetch = 0 : i64, scratch_operands = 0 : i64, tpu.core_type = #tpu.core_type<tc>, window_params = [{transform_indices = @transform_0, window_bounds = array<i64: 1, 8, 32>}, {pipeline_mode = #tpu.pipeline_mode<synchronous>, transform_indices = @transform_1, window_bounds = array<i64: 1, 32>}, {pipeline_mode = #tpu.pipeline_mode<synchronous>, transform_indices = @transform_2, window_bounds = array<i64: 1, 32>}, {pipeline_mode = #tpu.pipeline_mode<synchronous>, transform_indices = @transform_3, window_bounds = array<i64: 32, 2>}, {pipeline_mode = #tpu.pipeline_mode<synchronous>, transform_indices = @transform_4, window_bounds = array<i64: 2, 32>}, {pipeline_mode = #tpu.pipeline_mode<synchronous>, transform_indices = @transform_5, window_bounds = array<i64: 4, 32, 8>}, {pipeline_mode = #tpu.pipeline_mode<synchronous>, transform_indices = @transform_6, window_bounds = array<i64: 4, 32, 8>}, {pipeline_mode = #tpu.pipeline_mode<synchronous>, transform_indices = @transform_7, window_bounds = array<i64: 4, 32, 8>}, {pipeline_mode = #tpu.pipeline_mode<synchronous>, transform_indices = @transform_8, window_bounds = array<i64: 4, 8, 32>}, {pipeline_mode = #tpu.pipeline_mode<synchronous>, transform_indices = @transform_9, window_bounds = array<i64: 1, 32>}, {transform_indices = @transform_10, window_bounds = array<i64: 1, 8, 32>}]} {
    %c0 = arith.constant 0 : index
    %c0_0 = arith.constant 0 : index
    %c0_1 = arith.constant 0 : index
    %0 = vector.load %arg1[%c0, %c0_0, %c0_1] : memref<1x8x32xf32, #tpu.memory_space<vmem>>, vector<1x8x32xf32>
    %1 = vector.shape_cast %0 : vector<1x8x32xf32> to vector<8x32xf32>
    %c0_2 = arith.constant 0 : index
    %c0_3 = arith.constant 0 : index
    %2 = vector.load %arg2[%c0_2, %c0_3] : memref<1x32xf32, #tpu.memory_space<vmem>>, vector<1x32xf32>
    %c0_4 = arith.constant 0 : index
    %c0_5 = arith.constant 0 : index
    %3 = vector.load %arg3[%c0_4, %c0_5] : memref<1x32xf32, #tpu.memory_space<vmem>>, vector<1x32xf32>
    %cst = arith.constant dense<0.000000e+00> : vector<8xf32>
    %4 = vector.multi_reduction <add>, %1, %cst [1] : vector<8x32xf32> to vector<8xf32>
    %5 = vector.shape_cast %4 : vector<8xf32> to vector<8x1xf32>
    %cst_6 = arith.constant 3.200000e+01 : f32
    %6 = vector.broadcast %cst_6 : f32 to vector<8x1xf32>
    %7 = arith.divf %5, %6 : vector<8x1xf32>
    %8 = vector.broadcast %7 : vector<8x1xf32> to vector<8x32xf32>
    %9 = arith.subf %1, %8 : vector<8x32xf32>
    %10 = arith.mulf %9, %9 : vector<8x32xf32>
    %cst_7 = arith.constant dense<0.000000e+00> : vector<8xf32>
    %11 = vector.multi_reduction <add>, %10, %cst_7 [1] : vector<8x32xf32> to vector<8xf32>
    %12 = vector.shape_cast %11 : vector<8xf32> to vector<8x1xf32>
    %cst_8 = arith.constant 3.200000e+01 : f32
    %13 = vector.broadcast %cst_8 : f32 to vector<8x1xf32>
    %14 = arith.divf %12, %13 : vector<8x1xf32>
    %cst_9 = arith.constant 9.99999997E-7 : f32
    %15 = vector.broadcast %cst_9 : f32 to vector<8x1xf32>
    %16 = arith.addf %14, %15 : vector<8x1xf32>
    %17 = math.rsqrt %16 : vector<8x1xf32>
    %18 = vector.broadcast %17 : vector<8x1xf32> to vector<8x32xf32>
    %19 = arith.mulf %9, %18 : vector<8x32xf32>
    %20 = vector.broadcast %2 : vector<1x32xf32> to vector<8x32xf32>
    %21 = arith.mulf %19, %20 : vector<8x32xf32>
    %22 = vector.broadcast %3 : vector<1x32xf32> to vector<8x32xf32>
    %23 = arith.addf %21, %22 : vector<8x32xf32>
    %cst_10 = arith.constant dense<0.000000e+00> : vector<32xf32>
    %24 = vector.multi_reduction <add>, %23, %cst_10 [0] : vector<8x32xf32> to vector<32xf32>
    %25 = vector.shape_cast %24 : vector<32xf32> to vector<1x32xf32>
    %cst_11 = arith.constant 8.000000e+00 : f32
    %26 = vector.broadcast %cst_11 : f32 to vector<1x32xf32>
    %27 = arith.divf %25, %26 : vector<1x32xf32>
    %c0_12 = arith.constant 0 : index
    %c0_13 = arith.constant 0 : index
    %28 = vector.load %arg4[%c0_12, %c0_13] : memref<32x2xf32, #tpu.memory_space<vmem>>, vector<32x2xf32>
    %cst_14 = arith.constant dense<0.000000e+00> : vector<1x2xf32>
    %29 = tpu.matmul %27, %28, %cst_14 {dimension_numbers = #tpu.dot_dimension_numbers<[1], [0], [0], [1], [0, 0, 1, 1], [], []>} : vector<1x32xf32>, vector<32x2xf32>, vector<1x2xf32> -> vector<1x2xf32>
    %cst_15 = arith.constant 0.000000e+00 : f32
    %30 = vector.broadcast %cst_15 : f32 to vector<1x2xf32>
    %31 = arith.maximumf %29, %30 : vector<1x2xf32>
    %c0_16 = arith.constant 0 : index
    %c0_17 = arith.constant 0 : index
    %32 = vector.load %arg5[%c0_16, %c0_17] : memref<2x32xf32, #tpu.memory_space<vmem>>, vector<2x32xf32>
    %cst_18 = arith.constant dense<0.000000e+00> : vector<1x32xf32>
    %33 = tpu.matmul %31, %32, %cst_18 {dimension_numbers = #tpu.dot_dimension_numbers<[1], [0], [0], [1], [0, 0, 1, 1], [], []>} : vector<1x2xf32>, vector<2x32xf32>, vector<1x32xf32> -> vector<1x32xf32>
    %34 = arith.negf %33 : vector<1x32xf32>
    %35 = math.exp %34 : vector<1x32xf32>
    %cst_19 = arith.constant 1.000000e+00 : f32
    %36 = vector.broadcast %cst_19 : f32 to vector<1x32xf32>
    %37 = arith.addf %36, %35 : vector<1x32xf32>
    %38 = arith.divf %36, %37 : vector<1x32xf32>
    %39 = vector.broadcast %38 : vector<1x32xf32> to vector<8x32xf32>
    %40 = arith.mulf %23, %39 : vector<8x32xf32>
    %cst_20 = arith.constant 0.000000e+00 : f32
    %41 = vector.broadcast %cst_20 : f32 to vector<8x32xf32>
    %c0_21 = arith.constant 0 : index
    %c0_22 = arith.constant 0 : index
    %c0_23 = arith.constant 0 : index
    %42 = vector.load %arg6[%c0_21, %c0_22, %c0_23] : memref<4x32x8xf32, #tpu.memory_space<vmem>>, vector<1x32x8xf32>
    %43 = vector.shape_cast %42 : vector<1x32x8xf32> to vector<32x8xf32>
    %cst_24 = arith.constant dense<0.000000e+00> : vector<8x8xf32>
    %44 = tpu.matmul %40, %43, %cst_24 {dimension_numbers = #tpu.dot_dimension_numbers<[1], [0], [0], [1], [0, 0, 1, 1], [], []>} : vector<8x32xf32>, vector<32x8xf32>, vector<8x8xf32> -> vector<8x8xf32>
    %c0_25 = arith.constant 0 : index
    %c0_26 = arith.constant 0 : index
    %c0_27 = arith.constant 0 : index
    %45 = vector.load %arg7[%c0_25, %c0_26, %c0_27] : memref<4x32x8xf32, #tpu.memory_space<vmem>>, vector<1x32x8xf32>
    %46 = vector.shape_cast %45 : vector<1x32x8xf32> to vector<32x8xf32>
    %cst_28 = arith.constant dense<0.000000e+00> : vector<8x8xf32>
    %47 = tpu.matmul %40, %46, %cst_28 {dimension_numbers = #tpu.dot_dimension_numbers<[1], [0], [0], [1], [0, 0, 1, 1], [], []>} : vector<8x32xf32>, vector<32x8xf32>, vector<8x8xf32> -> vector<8x8xf32>
    %c0_29 = arith.constant 0 : index
    %c0_30 = arith.constant 0 : index
    %c0_31 = arith.constant 0 : index
    %48 = vector.load %arg8[%c0_29, %c0_30, %c0_31] : memref<4x32x8xf32, #tpu.memory_space<vmem>>, vector<1x32x8xf32>
    %49 = vector.shape_cast %48 : vector<1x32x8xf32> to vector<32x8xf32>
    %cst_32 = arith.constant dense<0.000000e+00> : vector<8x8xf32>
    %50 = tpu.matmul %40, %49, %cst_32 {dimension_numbers = #tpu.dot_dimension_numbers<[1], [0], [0], [1], [0, 0, 1, 1], [], []>} : vector<8x32xf32>, vector<32x8xf32>, vector<8x8xf32> -> vector<8x8xf32>
    %cst_33 = arith.constant dense<0.000000e+00> : vector<8x8xf32>
    %51 = tpu.matmul %44, %47, %cst_33 {dimension_numbers = #tpu.dot_dimension_numbers<[1], [1], [0], [0], [0, 0, 1, 0], [], []>} : vector<8x8xf32>, vector<8x8xf32>, vector<8x8xf32> -> vector<8x8xf32>
    %cst_34 = arith.constant 0.176776692 : f32
    %52 = vector.broadcast %cst_34 : f32 to vector<8x8xf32>
    %53 = arith.mulf %51, %52 : vector<8x8xf32>
    %cst_35 = arith.constant dense<0xFF800000> : vector<8xf32>
    %54 = vector.multi_reduction <maximumf>, %53, %cst_35 [1] : vector<8x8xf32> to vector<8xf32>
    %55 = vector.shape_cast %54 : vector<8xf32> to vector<8x1xf32>
    %56 = vector.broadcast %55 : vector<8x1xf32> to vector<8x8xf32>
    %57 = arith.subf %53, %56 : vector<8x8xf32>
    %58 = math.exp %57 : vector<8x8xf32>
    %cst_36 = arith.constant dense<0.000000e+00> : vector<8xf32>
    %59 = vector.multi_reduction <add>, %58, %cst_36 [1] : vector<8x8xf32> to vector<8xf32>
    %60 = vector.shape_cast %59 : vector<8xf32> to vector<8x1xf32>
    %61 = tpu.reciprocal %60 {approx = true} : vector<8x1xf32> -> vector<8x1xf32>
    %62 = vector.broadcast %61 : vector<8x1xf32> to vector<8x8xf32>
    %63 = arith.mulf %58, %62 : vector<8x8xf32>
    %cst_37 = arith.constant dense<0.000000e+00> : vector<8x8xf32>
    %64 = tpu.matmul %63, %50, %cst_37 {dimension_numbers = #tpu.dot_dimension_numbers<[1], [0], [0], [1], [0, 0, 1, 1], [], []>} : vector<8x8xf32>, vector<8x8xf32>, vector<8x8xf32> -> vector<8x8xf32>
    %c0_38 = arith.constant 0 : index
    %c0_39 = arith.constant 0 : index
    %c0_40 = arith.constant 0 : index
    %65 = vector.load %arg9[%c0_38, %c0_39, %c0_40] : memref<4x8x32xf32, #tpu.memory_space<vmem>>, vector<1x8x32xf32>
    %66 = vector.shape_cast %65 : vector<1x8x32xf32> to vector<8x32xf32>
    %cst_41 = arith.constant dense<0.000000e+00> : vector<8x32xf32>
    %67 = tpu.matmul %64, %66, %cst_41 {dimension_numbers = #tpu.dot_dimension_numbers<[1], [0], [0], [1], [0, 0, 1, 1], [], []>} : vector<8x8xf32>, vector<8x32xf32>, vector<8x32xf32> -> vector<8x32xf32>
    %68 = arith.addf %41, %67 : vector<8x32xf32>
    %c1 = arith.constant 1 : index
    %c0_42 = arith.constant 0 : index
    %c0_43 = arith.constant 0 : index
    %69 = vector.load %arg6[%c1, %c0_42, %c0_43] : memref<4x32x8xf32, #tpu.memory_space<vmem>>, vector<1x32x8xf32>
    %70 = vector.shape_cast %69 : vector<1x32x8xf32> to vector<32x8xf32>
    %cst_44 = arith.constant dense<0.000000e+00> : vector<8x8xf32>
    %71 = tpu.matmul %40, %70, %cst_44 {dimension_numbers = #tpu.dot_dimension_numbers<[1], [0], [0], [1], [0, 0, 1, 1], [], []>} : vector<8x32xf32>, vector<32x8xf32>, vector<8x8xf32> -> vector<8x8xf32>
    %c1_45 = arith.constant 1 : index
    %c0_46 = arith.constant 0 : index
    %c0_47 = arith.constant 0 : index
    %72 = vector.load %arg7[%c1_45, %c0_46, %c0_47] : memref<4x32x8xf32, #tpu.memory_space<vmem>>, vector<1x32x8xf32>
    %73 = vector.shape_cast %72 : vector<1x32x8xf32> to vector<32x8xf32>
    %cst_48 = arith.constant dense<0.000000e+00> : vector<8x8xf32>
    %74 = tpu.matmul %40, %73, %cst_48 {dimension_numbers = #tpu.dot_dimension_numbers<[1], [0], [0], [1], [0, 0, 1, 1], [], []>} : vector<8x32xf32>, vector<32x8xf32>, vector<8x8xf32> -> vector<8x8xf32>
    %c1_49 = arith.constant 1 : index
    %c0_50 = arith.constant 0 : index
    %c0_51 = arith.constant 0 : index
    %75 = vector.load %arg8[%c1_49, %c0_50, %c0_51] : memref<4x32x8xf32, #tpu.memory_space<vmem>>, vector<1x32x8xf32>
    %76 = vector.shape_cast %75 : vector<1x32x8xf32> to vector<32x8xf32>
    %cst_52 = arith.constant dense<0.000000e+00> : vector<8x8xf32>
    %77 = tpu.matmul %40, %76, %cst_52 {dimension_numbers = #tpu.dot_dimension_numbers<[1], [0], [0], [1], [0, 0, 1, 1], [], []>} : vector<8x32xf32>, vector<32x8xf32>, vector<8x8xf32> -> vector<8x8xf32>
    %cst_53 = arith.constant dense<0.000000e+00> : vector<8x8xf32>
    %78 = tpu.matmul %71, %74, %cst_53 {dimension_numbers = #tpu.dot_dimension_numbers<[1], [1], [0], [0], [0, 0, 1, 0], [], []>} : vector<8x8xf32>, vector<8x8xf32>, vector<8x8xf32> -> vector<8x8xf32>
    %cst_54 = arith.constant 0.176776692 : f32
    %79 = vector.broadcast %cst_54 : f32 to vector<8x8xf32>
    %80 = arith.mulf %78, %79 : vector<8x8xf32>
    %cst_55 = arith.constant dense<0xFF800000> : vector<8xf32>
    %81 = vector.multi_reduction <maximumf>, %80, %cst_55 [1] : vector<8x8xf32> to vector<8xf32>
    %82 = vector.shape_cast %81 : vector<8xf32> to vector<8x1xf32>
    %83 = vector.broadcast %82 : vector<8x1xf32> to vector<8x8xf32>
    %84 = arith.subf %80, %83 : vector<8x8xf32>
    %85 = math.exp %84 : vector<8x8xf32>
    %cst_56 = arith.constant dense<0.000000e+00> : vector<8xf32>
    %86 = vector.multi_reduction <add>, %85, %cst_56 [1] : vector<8x8xf32> to vector<8xf32>
    %87 = vector.shape_cast %86 : vector<8xf32> to vector<8x1xf32>
    %88 = tpu.reciprocal %87 {approx = true} : vector<8x1xf32> -> vector<8x1xf32>
    %89 = vector.broadcast %88 : vector<8x1xf32> to vector<8x8xf32>
    %90 = arith.mulf %85, %89 : vector<8x8xf32>
    %cst_57 = arith.constant dense<0.000000e+00> : vector<8x8xf32>
    %91 = tpu.matmul %90, %77, %cst_57 {dimension_numbers = #tpu.dot_dimension_numbers<[1], [0], [0], [1], [0, 0, 1, 1], [], []>} : vector<8x8xf32>, vector<8x8xf32>, vector<8x8xf32> -> vector<8x8xf32>
    %c1_58 = arith.constant 1 : index
    %c0_59 = arith.constant 0 : index
    %c0_60 = arith.constant 0 : index
    %92 = vector.load %arg9[%c1_58, %c0_59, %c0_60] : memref<4x8x32xf32, #tpu.memory_space<vmem>>, vector<1x8x32xf32>
    %93 = vector.shape_cast %92 : vector<1x8x32xf32> to vector<8x32xf32>
    %cst_61 = arith.constant dense<0.000000e+00> : vector<8x32xf32>
    %94 = tpu.matmul %91, %93, %cst_61 {dimension_numbers = #tpu.dot_dimension_numbers<[1], [0], [0], [1], [0, 0, 1, 1], [], []>} : vector<8x8xf32>, vector<8x32xf32>, vector<8x32xf32> -> vector<8x32xf32>
    %95 = arith.addf %68, %94 : vector<8x32xf32>
    %c2 = arith.constant 2 : index
    %c0_62 = arith.constant 0 : index
    %c0_63 = arith.constant 0 : index
    %96 = vector.load %arg6[%c2, %c0_62, %c0_63] : memref<4x32x8xf32, #tpu.memory_space<vmem>>, vector<1x32x8xf32>
    %97 = vector.shape_cast %96 : vector<1x32x8xf32> to vector<32x8xf32>
    %cst_64 = arith.constant dense<0.000000e+00> : vector<8x8xf32>
    %98 = tpu.matmul %40, %97, %cst_64 {dimension_numbers = #tpu.dot_dimension_numbers<[1], [0], [0], [1], [0, 0, 1, 1], [], []>} : vector<8x32xf32>, vector<32x8xf32>, vector<8x8xf32> -> vector<8x8xf32>
    %c2_65 = arith.constant 2 : index
    %c0_66 = arith.constant 0 : index
    %c0_67 = arith.constant 0 : index
    %99 = vector.load %arg7[%c2_65, %c0_66, %c0_67] : memref<4x32x8xf32, #tpu.memory_space<vmem>>, vector<1x32x8xf32>
    %100 = vector.shape_cast %99 : vector<1x32x8xf32> to vector<32x8xf32>
    %cst_68 = arith.constant dense<0.000000e+00> : vector<8x8xf32>
    %101 = tpu.matmul %40, %100, %cst_68 {dimension_numbers = #tpu.dot_dimension_numbers<[1], [0], [0], [1], [0, 0, 1, 1], [], []>} : vector<8x32xf32>, vector<32x8xf32>, vector<8x8xf32> -> vector<8x8xf32>
    %c2_69 = arith.constant 2 : index
    %c0_70 = arith.constant 0 : index
    %c0_71 = arith.constant 0 : index
    %102 = vector.load %arg8[%c2_69, %c0_70, %c0_71] : memref<4x32x8xf32, #tpu.memory_space<vmem>>, vector<1x32x8xf32>
    %103 = vector.shape_cast %102 : vector<1x32x8xf32> to vector<32x8xf32>
    %cst_72 = arith.constant dense<0.000000e+00> : vector<8x8xf32>
    %104 = tpu.matmul %40, %103, %cst_72 {dimension_numbers = #tpu.dot_dimension_numbers<[1], [0], [0], [1], [0, 0, 1, 1], [], []>} : vector<8x32xf32>, vector<32x8xf32>, vector<8x8xf32> -> vector<8x8xf32>
    %cst_73 = arith.constant dense<0.000000e+00> : vector<8x8xf32>
    %105 = tpu.matmul %98, %101, %cst_73 {dimension_numbers = #tpu.dot_dimension_numbers<[1], [1], [0], [0], [0, 0, 1, 0], [], []>} : vector<8x8xf32>, vector<8x8xf32>, vector<8x8xf32> -> vector<8x8xf32>
    %cst_74 = arith.constant 0.176776692 : f32
    %106 = vector.broadcast %cst_74 : f32 to vector<8x8xf32>
    %107 = arith.mulf %105, %106 : vector<8x8xf32>
    %cst_75 = arith.constant dense<0xFF800000> : vector<8xf32>
    %108 = vector.multi_reduction <maximumf>, %107, %cst_75 [1] : vector<8x8xf32> to vector<8xf32>
    %109 = vector.shape_cast %108 : vector<8xf32> to vector<8x1xf32>
    %110 = vector.broadcast %109 : vector<8x1xf32> to vector<8x8xf32>
    %111 = arith.subf %107, %110 : vector<8x8xf32>
    %112 = math.exp %111 : vector<8x8xf32>
    %cst_76 = arith.constant dense<0.000000e+00> : vector<8xf32>
    %113 = vector.multi_reduction <add>, %112, %cst_76 [1] : vector<8x8xf32> to vector<8xf32>
    %114 = vector.shape_cast %113 : vector<8xf32> to vector<8x1xf32>
    %115 = tpu.reciprocal %114 {approx = true} : vector<8x1xf32> -> vector<8x1xf32>
    %116 = vector.broadcast %115 : vector<8x1xf32> to vector<8x8xf32>
    %117 = arith.mulf %112, %116 : vector<8x8xf32>
    %cst_77 = arith.constant dense<0.000000e+00> : vector<8x8xf32>
    %118 = tpu.matmul %117, %104, %cst_77 {dimension_numbers = #tpu.dot_dimension_numbers<[1], [0], [0], [1], [0, 0, 1, 1], [], []>} : vector<8x8xf32>, vector<8x8xf32>, vector<8x8xf32> -> vector<8x8xf32>
    %c2_78 = arith.constant 2 : index
    %c0_79 = arith.constant 0 : index
    %c0_80 = arith.constant 0 : index
    %119 = vector.load %arg9[%c2_78, %c0_79, %c0_80] : memref<4x8x32xf32, #tpu.memory_space<vmem>>, vector<1x8x32xf32>
    %120 = vector.shape_cast %119 : vector<1x8x32xf32> to vector<8x32xf32>
    %cst_81 = arith.constant dense<0.000000e+00> : vector<8x32xf32>
    %121 = tpu.matmul %118, %120, %cst_81 {dimension_numbers = #tpu.dot_dimension_numbers<[1], [0], [0], [1], [0, 0, 1, 1], [], []>} : vector<8x8xf32>, vector<8x32xf32>, vector<8x32xf32> -> vector<8x32xf32>
    %122 = arith.addf %95, %121 : vector<8x32xf32>
    %c3 = arith.constant 3 : index
    %c0_82 = arith.constant 0 : index
    %c0_83 = arith.constant 0 : index
    %123 = vector.load %arg6[%c3, %c0_82, %c0_83] : memref<4x32x8xf32, #tpu.memory_space<vmem>>, vector<1x32x8xf32>
    %124 = vector.shape_cast %123 : vector<1x32x8xf32> to vector<32x8xf32>
    %cst_84 = arith.constant dense<0.000000e+00> : vector<8x8xf32>
    %125 = tpu.matmul %40, %124, %cst_84 {dimension_numbers = #tpu.dot_dimension_numbers<[1], [0], [0], [1], [0, 0, 1, 1], [], []>} : vector<8x32xf32>, vector<32x8xf32>, vector<8x8xf32> -> vector<8x8xf32>
    %c3_85 = arith.constant 3 : index
    %c0_86 = arith.constant 0 : index
    %c0_87 = arith.constant 0 : index
    %126 = vector.load %arg7[%c3_85, %c0_86, %c0_87] : memref<4x32x8xf32, #tpu.memory_space<vmem>>, vector<1x32x8xf32>
    %127 = vector.shape_cast %126 : vector<1x32x8xf32> to vector<32x8xf32>
    %cst_88 = arith.constant dense<0.000000e+00> : vector<8x8xf32>
    %128 = tpu.matmul %40, %127, %cst_88 {dimension_numbers = #tpu.dot_dimension_numbers<[1], [0], [0], [1], [0, 0, 1, 1], [], []>} : vector<8x32xf32>, vector<32x8xf32>, vector<8x8xf32> -> vector<8x8xf32>
    %c3_89 = arith.constant 3 : index
    %c0_90 = arith.constant 0 : index
    %c0_91 = arith.constant 0 : index
    %129 = vector.load %arg8[%c3_89, %c0_90, %c0_91] : memref<4x32x8xf32, #tpu.memory_space<vmem>>, vector<1x32x8xf32>
    %130 = vector.shape_cast %129 : vector<1x32x8xf32> to vector<32x8xf32>
    %cst_92 = arith.constant dense<0.000000e+00> : vector<8x8xf32>
    %131 = tpu.matmul %40, %130, %cst_92 {dimension_numbers = #tpu.dot_dimension_numbers<[1], [0], [0], [1], [0, 0, 1, 1], [], []>} : vector<8x32xf32>, vector<32x8xf32>, vector<8x8xf32> -> vector<8x8xf32>
    %cst_93 = arith.constant dense<0.000000e+00> : vector<8x8xf32>
    %132 = tpu.matmul %125, %128, %cst_93 {dimension_numbers = #tpu.dot_dimension_numbers<[1], [1], [0], [0], [0, 0, 1, 0], [], []>} : vector<8x8xf32>, vector<8x8xf32>, vector<8x8xf32> -> vector<8x8xf32>
    %cst_94 = arith.constant 0.176776692 : f32
    %133 = vector.broadcast %cst_94 : f32 to vector<8x8xf32>
    %134 = arith.mulf %132, %133 : vector<8x8xf32>
    %cst_95 = arith.constant dense<0xFF800000> : vector<8xf32>
    %135 = vector.multi_reduction <maximumf>, %134, %cst_95 [1] : vector<8x8xf32> to vector<8xf32>
    %136 = vector.shape_cast %135 : vector<8xf32> to vector<8x1xf32>
    %137 = vector.broadcast %136 : vector<8x1xf32> to vector<8x8xf32>
    %138 = arith.subf %134, %137 : vector<8x8xf32>
    %139 = math.exp %138 : vector<8x8xf32>
    %cst_96 = arith.constant dense<0.000000e+00> : vector<8xf32>
    %140 = vector.multi_reduction <add>, %139, %cst_96 [1] : vector<8x8xf32> to vector<8xf32>
    %141 = vector.shape_cast %140 : vector<8xf32> to vector<8x1xf32>
    %142 = tpu.reciprocal %141 {approx = true} : vector<8x1xf32> -> vector<8x1xf32>
    %143 = vector.broadcast %142 : vector<8x1xf32> to vector<8x8xf32>
    %144 = arith.mulf %139, %143 : vector<8x8xf32>
    %cst_97 = arith.constant dense<0.000000e+00> : vector<8x8xf32>
    %145 = tpu.matmul %144, %131, %cst_97 {dimension_numbers = #tpu.dot_dimension_numbers<[1], [0], [0], [1], [0, 0, 1, 1], [], []>} : vector<8x8xf32>, vector<8x8xf32>, vector<8x8xf32> -> vector<8x8xf32>
    %c3_98 = arith.constant 3 : index
    %c0_99 = arith.constant 0 : index
    %c0_100 = arith.constant 0 : index
    %146 = vector.load %arg9[%c3_98, %c0_99, %c0_100] : memref<4x8x32xf32, #tpu.memory_space<vmem>>, vector<1x8x32xf32>
    %147 = vector.shape_cast %146 : vector<1x8x32xf32> to vector<8x32xf32>
    %cst_101 = arith.constant dense<0.000000e+00> : vector<8x32xf32>
    %148 = tpu.matmul %145, %147, %cst_101 {dimension_numbers = #tpu.dot_dimension_numbers<[1], [0], [0], [1], [0, 0, 1, 1], [], []>} : vector<8x8xf32>, vector<8x32xf32>, vector<8x32xf32> -> vector<8x32xf32>
    %149 = arith.addf %122, %148 : vector<8x32xf32>
    %150 = arith.addf %1, %149 : vector<8x32xf32>
    %c0_102 = arith.constant 0 : index
    %c0_103 = arith.constant 0 : index
    %151 = vector.load %arg10[%c0_102, %c0_103] : memref<1x32xf32, #tpu.memory_space<vmem>>, vector<1x32xf32>
    %152 = vector.broadcast %151 : vector<1x32xf32> to vector<8x32xf32>
    %153 = arith.addf %150, %152 : vector<8x32xf32>
    %c0_104 = arith.constant 0 : index
    %c0_105 = arith.constant 0 : index
    %c0_106 = arith.constant 0 : index
    %154 = vector.load %arg11[%c0_104, %c0_105, %c0_106] : memref<1x8x32xf32, #tpu.memory_space<vmem>>, vector<1x8x32xf32>
    %155 = vector.shape_cast %154 : vector<1x8x32xf32> to vector<8x32xf32>
    %156 = vector.shape_cast %153 : vector<8x32xf32> to vector<1x8x32xf32>
    tpu.vector_store %arg11[%c0_104, %c0_105, %c0_106], %156 {strides = array<i32>} : memref<1x8x32xf32, #tpu.memory_space<vmem>>, vector<1x8x32xf32>,
    return
  }
  func.func @transform_0(%arg0: i32) -> (i32, i32, i32) {
    %c0_i32 = arith.constant 0 : i32
    %c0_i32_0 = arith.constant 0 : i32
    %c0_i32_1 = arith.constant 0 : i32
    return %arg0, %c0_i32, %c0_i32_0 : i32, i32, i32
  }
  func.func @transform_1(%arg0: i32) -> (i32, i32) {
    %c0_i32 = arith.constant 0 : i32
    %c0_i32_0 = arith.constant 0 : i32
    %c0_i32_1 = arith.constant 0 : i32
    return %c0_i32, %c0_i32_0 : i32, i32
  }
  func.func @transform_2(%arg0: i32) -> (i32, i32) {
    %c0_i32 = arith.constant 0 : i32
    %c0_i32_0 = arith.constant 0 : i32
    %c0_i32_1 = arith.constant 0 : i32
    return %c0_i32, %c0_i32_0 : i32, i32
  }
  func.func @transform_3(%arg0: i32) -> (i32, i32) {
    %c0_i32 = arith.constant 0 : i32
    %c0_i32_0 = arith.constant 0 : i32
    %c0_i32_1 = arith.constant 0 : i32
    return %c0_i32, %c0_i32_0 : i32, i32
  }
  func.func @transform_4(%arg0: i32) -> (i32, i32) {
    %c0_i32 = arith.constant 0 : i32
    %c0_i32_0 = arith.constant 0 : i32
    %c0_i32_1 = arith.constant 0 : i32
    return %c0_i32, %c0_i32_0 : i32, i32
  }
  func.func @transform_5(%arg0: i32) -> (i32, i32, i32) {
    %c0_i32 = arith.constant 0 : i32
    %c0_i32_0 = arith.constant 0 : i32
    %c0_i32_1 = arith.constant 0 : i32
    %c0_i32_2 = arith.constant 0 : i32
    return %c0_i32, %c0_i32_0, %c0_i32_1 : i32, i32, i32
  }
  func.func @transform_6(%arg0: i32) -> (i32, i32, i32) {
    %c0_i32 = arith.constant 0 : i32
    %c0_i32_0 = arith.constant 0 : i32
    %c0_i32_1 = arith.constant 0 : i32
    %c0_i32_2 = arith.constant 0 : i32
    return %c0_i32, %c0_i32_0, %c0_i32_1 : i32, i32, i32
  }
  func.func @transform_7(%arg0: i32) -> (i32, i32, i32) {
    %c0_i32 = arith.constant 0 : i32
    %c0_i32_0 = arith.constant 0 : i32
    %c0_i32_1 = arith.constant 0 : i32
    %c0_i32_2 = arith.constant 0 : i32
    return %c0_i32, %c0_i32_0, %c0_i32_1 : i32, i32, i32
  }
  func.func @transform_8(%arg0: i32) -> (i32, i32, i32) {
    %c0_i32 = arith.constant 0 : i32
    %c0_i32_0 = arith.constant 0 : i32
    %c0_i32_1 = arith.constant 0 : i32
    %c0_i32_2 = arith.constant 0 : i32
    return %c0_i32, %c0_i32_0, %c0_i32_1 : i32, i32, i32
  }
  func.func @transform_9(%arg0: i32) -> (i32, i32) {
    %c0_i32 = arith.constant 0 : i32
    %c0_i32_0 = arith.constant 0 : i32
    %c0_i32_1 = arith.constant 0 : i32
    return %c0_i32, %c0_i32_0 : i32, i32
  }
  func.func @transform_10(%arg0: i32) -> (i32, i32, i32) {
    %c0_i32 = arith.constant 0 : i32
    %c0_i32_0 = arith.constant 0 : i32
    %c0_i32_1 = arith.constant 0 : i32
    return %arg0, %c0_i32, %c0_i32_0 : i32, i32, i32
  }
}

</mosaic_0001>

<bundles_post_ra>
// kernel: tpu_custom_call.1
= control target key start
LH: loop header
LB: loop body
LE: loop exit
PB: predicated region body
PF: predicated region fallthrough
CT: control target
= control target key end

     0   :  { %15 = vsyncpa [#allocation3], 0  ;;  %s3575_s0 = inlined_call_operand.vmem [shape: f32[2,8,32], index: 0, kind: input, shape index: {}]   ;;  %s3576_s1 = inlined_call_operand.vmem [shape: f32[1,32], index: 1, kind: input, shape index: {}]   ;;  %s3577_s2 = inlined_call_operand.vmem [shape: f32[1,32], index: 2, kind: input, shape index: {}]   ;;  %s3578_s3 = inlined_call_operand.vmem [shape: f32[32,2], index: 3, kind: input, shape index: {}]   ;;  %s3579_s4 = inlined_call_operand.vmem [shape: f32[2,32], index: 4, kind: input, shape index: {}]   ;;  %s3580_s5 = inlined_call_operand.vmem [shape: f32[4,32,8], index: 5, kind: input, shape index: {}]   ;;  %s3581_s6 = inlined_call_operand.vmem [shape: f32[4,32,8], index: 6, kind: input, shape index: {}]   ;;  %s3582_s7 = inlined_call_operand.vmem [shape: f32[4,32,8], index: 7, kind: input, shape index: {}]   ;;  %s3583_s8 = inlined_call_operand.vmem [shape: f32[4,8,32], index: 8, kind: input, shape index: {}]   ;;  %s3584_s9 = inlined_call_operand.vmem [shape: f32[1,32], index: 9, kind: input, shape index: {}]   ;;  %s3585_s10 = inlined_call_operand.hbm [shape: f32[2,8,32], index: 10, kind: output, shape index: {}]  }
   0x1   :  { %17 = vsyncpa [#allocation3 + $0x1], 0  ;;  %s3141_s13 = smov 0   ;;  %s3143_s14 = smov 0  }
   0x2   :  { %s3145_s15 = smov 0   ;;  %s3147_s16 = smov 0  }
   0x3 LB: > { %s3162_s17 = sadd.s32 4294967295, %s3080_s16   ;;  %s2493_s18 = sadd.s32 4294967294, %s3080_s16   ;;  %s3080_s16 = sphi %s3147_s16, %s3591_s16   ;;  %s3076_s15 = sphi %s3145_s15, %s3590_s15   ;;  %s3072_s14 = sphi %s3143_s14, %s3589_s14   ;;  %s3068_s13 = sphi %s3141_s13, %s3588_s13  }
   0x4   : > { %s3166_s19 = sadd.s32 1, %s3080_s16   ;;  %s245_s20 = sadd.s32 1, %s3076_s15 }
   0x5   : > { %s242_s21 = ssub.s32 %s3080_s16, %s3166_s19  ;;  %p255_p0 = scmp.ne.s32.totalorder %s3076_s15, %s3072_s14 }
   0x6   : > { %p243_p1 = scmp.eq.s32.totalorder %s242_s21, 0  ;;  %p256_p2 = scmp.eq.s32.totalorder %s3162_s17, 1 }
   0x7   : > { %p261_p3 = scmp.ne.s32.totalorder %s3072_s14, %s3068_s13  ;;  %p262_p4 = scmp.eq.s32.totalorder %s2493_s18, 1 }
   0x8   : > { %s3177_s22 = scalar_select %p243_p1, %s3076_s15, %s245_s20  }
   0x9   : > { %p3179_p5 = por %p256_p2, %p255_p0  ;;  %p3183_p6 = por %p262_p4, %p261_p3 }
   0xa   : > { %p2496_p7 = scmp.ge.s32.totalorder %s3080_s16, 1  ;;  %p314_p8 = scmp.lt.s32.totalorder %s3080_s16, 3 }
   0xc   : > { %p315_p9 = pnand %p2496_p7, %p314_p8 }
   0xd   : > { %p351_p10 = scmp.lt.s32.totalorder (!%p315_p9), %s3162_s17, 1  ;;  %vm358_vm0 = vcmask (!%p315_p9), 261120   ;;  %v396_v7 = vld [vmem:[%s3578_s3] sm:$0xff] (!%p315_p9)  ;;  %v397_v8 = vld [vmem:[%s3578_s3 + $0x8] sm:$0xff] (!%p315_p9)  ;;  %v398_v9 = vld [vmem:[%s3578_s3 + $0x10] sm:$0xff] (!%p315_p9)  ;;  %v3082_v10 = vmov (!%p315_p9), 0.0|0.0   ;;  %v559_v53 = vlaneseq (!%p315_p9) }
   0xe   : > { %318 = sbr.rel (%p315_p9) target bundleno = 4671 (0x123f), region = 60  ;;  %2876 = vmatprep.subr.bf16.mxu0 (!%p315_p9), %v3082_v10  ;;  %v2877_v11 = vpack.c.bf16 (!%p315_p9), %v397_v8, %v396_v7  ;;  %v399_v12 = vld [vmem:[%s3578_s3 + $0x18] sm:$0xff] (!%p315_p9)  ;;  %vm3083_vm1 = vmmov (!%p315_p9), 0   ;;  %v3084_v13 = vmov (!%p315_p9), 0.0   ;;  %v2499_v19 = vld [vmem:[%s3576_s1] ss:$0 sm:$0xff] (!%p315_p9) }
   0xf   : > { %2676 = vmatprep.mubr.msk.f32.mxu0 (!%p315_p9), %vm3083_vm1, %v3084_v13  ;;  %2679 = vmatprep.subr.mxu1 (!%p315_p9), %v3084_v13  ;;  %v2880_v14 = vpack.c.bf16 (!%p315_p9), %v399_v12, %v398_v9  ;;  %v2500_v21 = vld [vmem:[%s3577_s2] ss:$0 sm:$0xff] (!%p315_p9)  ;;  %vm479_vm2 = vcmask (!%p315_p9), 1041408   ;;  %vm475_vm3 = vcmask (!%p315_p9), 15360   ;;  %v565_v37 = vld [vmem:[%s3580_s5 + $0x8] sm:$0xff] (!%p315_p9)  ;;  %v566_v42 = vld [vmem:[%s3580_s5 + $0x10] sm:$0xff] (!%p315_p9) }
  0x10   : > { %2681 = vmatprep.mubr.msk.f32.mxu1 (!%p315_p9), %vm3083_vm1, %v3084_v13  ;;  %2878 = vmatpush3.bf16.msra.mxu0 (!%p315_p9), %v2877_v11  ;;  %v474_v32 = vld [vmem:[%s3579_s4] sm:$0x3] (!%p315_p9)  ;;  %v642_v40 = vld [vmem:[%s3581_s6 + $0x8] sm:$0xff] (!%p315_p9)  ;;  %v567_v43 = vld [vmem:[%s3580_s5 + $0x18] sm:$0xff] (!%p315_p9)  ;;  %v560_v54 = vshrl.u32 (!%p315_p9), %v559_v53, 7  ;;  %vm789_vm4 = vcmask (!%p315_p9), 64512  }
  0x11   : > { %2879 = vmatprep.subr.bf16.mxu0 (!%p315_p9), %v3082_v10  ;;  %2680 = vmatpush3.msk.msra.mxu1 (!%p315_p9), %vm479_vm2, %v474_v32  ;;  %v564_v36 = vld [vmem:[%s3580_s5] sm:$0xff] (!%p315_p9)  ;;  %v2886_v44 = vpack.c.bf16 (!%p315_p9), %v567_v43, %v566_v42  ;;  %v643_v45 = vld [vmem:[%s3581_s6 + $0x10] sm:$0xff] (!%p315_p9)  ;;  %v644_v46 = vld [vmem:[%s3581_s6 + $0x18] sm:$0xff] (!%p315_p9)  ;;  %s348_s27 = sand.u32 (!%p315_p9), 1, %s3072_s14   ;;  %s2574_s11 = sshll.u32 (!%p315_p9), %s3162_s17, 7 }
  0x12   : > { %2882 = vmatprep.subr.bf16.mxu1 (!%p315_p9), %v3082_v10  ;;  %v2883_v38 = vpack.c.bf16 (!%p315_p9), %v565_v37, %v564_v36  ;;  %v641_v39 = vld [vmem:[%s3581_s6] sm:$0xff] (!%p315_p9)  ;;  %v2892_v47 = vpack.c.bf16 (!%p315_p9), %v644_v46, %v643_v45  ;;  %v561_v55 = vsub.s32 (!%p315_p9), 0, %v560_v54  ;;  %v716_v57 = vld [vmem:[%s3582_s7 + $0x8] sm:$0xff] (!%p315_p9)  ;;  %v717_v62 = vld [vmem:[%s3582_s7 + $0x10] sm:$0xff] (!%p315_p9)  ;;  %s2497_s28 = sshll.u32 (!%p315_p9), %s348_s27, 3 }
  0x13   : > { %v2889_v41 = vpack.c.bf16 (!%p315_p9), %v642_v40, %v641_v39  ;;  %v715_v56 = vld [vmem:[%s3582_s7] sm:$0xff] (!%p315_p9)  ;;  %v718_v63 = vld [vmem:[%s3582_s7 + $0x18] sm:$0xff] (!%p315_p9)  ;;  %v2513_v9 = vld [vmem:[%s3580_s5 + $0x30] sm:$0xff] (!%p315_p9)  ;;  %s350_s12 = scalar_lea.vmem (!%p315_p9), [#allocation2], %s2497_s28 }
  0x14   : > { %2881 = vmatpush3.bf16.msra.mxu0 (!%p315_p9), %v2880_v14  ;;  %v2895_v60 = vpack.c.bf16 (!%p315_p9), %v716_v57, %v715_v56  ;;  %v2514_v11 = vld [vmem:[%s3580_s5 + $0x38] sm:$0xff] (!%p315_p9)  ;;  %v2521_v14 = vld [vmem:[%s3582_s7 + $0x20] sm:$0xff] (!%p315_p9)  ;;  %v2517_v37 = vld [vmem:[%s3581_s6 + $0x28] sm:$0xff] (!%p315_p9)  ;;  %s2434_s18 = sshll.u32 (!%p315_p9), %s350_s12, 4  ;;  %s3534_s18 = int_to_ptr.vmem [resolvable:$true] %s2434_s18 }
  0x15   : > { %s352_s25 = scalar_select %p351_p10, %s3162_s17, 1  ;;  %2888 = vmatprep.subr.bf16.mxu0 %v3082_v10  ;;  %v2904_v12 = vpack.c.bf16 %v2514_v11, %v2513_v9  ;;  %v2516_v36 = vld [vmem:[%s3581_s6 + $0x20] sm:$0xff]  ;;  %v2519_v42 = vld [vmem:[%s3581_s6 + $0x38] sm:$0xff]  ;;  %v2529_v57 = vld [vmem:[%s3583_s8 + $0x8] sm:$0xff] }
  0x16   : > { %v2907_v39 = vpack.c.bf16 %v2517_v37, %v2516_v36  ;;  %v2534_v9 = vld [vmem:[%s3580_s5 + $0x50] sm:$0xff]  ;;  %v2535_v11 = vld [vmem:[%s3580_s5 + $0x58] sm:$0xff]  ;;  %s3085_s17 = smov [#allocation2]  }
  0x17   : > { %s2498_s26 = sshll.u32 %s352_s25, 3  ;;  %s3532_s25 = scalar_lea.hbm %s3585_s10, %s2574_s11 }
  0x18   : > { %s354_s29 = scalar_lea.vmem %s3575_s0, %s2498_s26  ;;  %s2421_s26 = scalar_lea.sflag [#allocation3], %s348_s27 }
  0x19   : > { %v3194_v0 = vld [vmem:[%s354_s29] sm:$0xff]  ;;  %s3018_s29 = scalar_lea.vmem %s3534_s18, 128  ;;  %s3022_s28 = sshll.u32 %s3085_s17, 4  ;;  %s3023_s28 = int_to_ptr.vmem [resolvable:$false] %s3022_s28 }
  0x1a   : > { %v359_v1 = vsel %vm358_vm0, %v3194_v0, 0.0  ;;  %p3019_p11 = scmp.ne.s32.totalorder %s3534_s18, %s3018_s29  ;;  %s3024_s30 = scalar_lea.vmem %s3023_s28, 256 }
  0x1b   : > { %360 = vadd.xlane.f32.xlu0 %v359_v1  ;;  %v2898_v1 = vpack.c.bf16 %v718_v63, %v717_v62  ;;  %v951_v62 = vld [vmem:[%s3583_s8] sm:$0xff]  ;;  %p3025_p0 = scmp.lt.s32.totalorder %s3534_s18, %s3023_s28  ;;  %p3026_p1 = scmp.lt.s32.totalorder %s3024_s30, %s3018_s29 }
  0x1c   : > { %v2537_v63 = vld [vmem:[%s3581_s6 + $0x40] sm:$0xff]  ;;  %p3020_p12 = pnand %p3019_p11, %p3179_p5 }
  0x1d   : > { %p3027_p2 = por %p3026_p1, %p3025_p0 }
  0x1e   : > { %p3021_p13 = pneg %p3020_p12 }
  0x20   : > { %p3028_p3 = pnand %p3027_p2, %p3021_p13 }
  0xa8   : > { %v361_v2 = vpop.xlane.xlu0 %360 }
  0xa9   : > { %v363_v3 = vmul.f32 0.03125, %v361_v2  ;;  %v2511_v2 = vld [vmem:[%s3580_s5 + $0x20] sm:$0xff] }
  0xab   : > { %v364_v4 = vsub.f32 %v3194_v0, %v363_v3  ;;  %v2512_v3 = vld [vmem:[%s3580_s5 + $0x28] sm:$0xff] }
  0xac   : > { %v2901_v8 = vpack.c.bf16 %v2512_v3, %v2511_v2  ;;  %v2539_v3 = vld [vmem:[%s3581_s6 + $0x50] sm:$0xff] }
  0xad   : > { %v365_v5 = vmul.f32 %v364_v4, %v364_v4 }
  0xaf   : > { %v366_v6 = vsel %vm358_vm0, %v365_v5, 0.0 }
  0xb0   : > { %367 = vadd.xlane.f32.xlu0 %v366_v6 }
 0x13d   : > { %v368_v15 = vpop.xlane.xlu0 %367 }
 0x13e   : > { %v369_v16 = vmul.f32 0.03125, %v368_v15  ;;  %v2522_v15 = vld [vmem:[%s3582_s7 + $0x28] sm:$0xff] }
 0x140   : > { %v370_v17 = vadd.f32 1e-06, %v369_v16 }
 0x142   : > { %2996 = vrsqrt.f32 %v370_v17 }
 0x14c   : > { %v2997_v18 = vpop.eup %2996 }
 0x14d   : > { %v372_v20 = vmul.f32 %v2997_v18, %v364_v4  ;;  %v2913_v18 = vpack.c.bf16 %v2522_v15, %v2521_v14  ;;  %v2922_v15 = vpack.c.bf16 %v2535_v11, %v2534_v9 }
 0x14f   : > { %v379_v22 = vmul.f32 %v2499_v19, %v372_v20  ;;  %v2523_v19 = vld [vmem:[%s3582_s7 + $0x30] sm:$0xff]  ;;  %v2524_v20 = vld [vmem:[%s3582_s7 + $0x38] sm:$0xff] }
 0x151   : > { %v386_v23 = vadd.f32 %v2500_v21, %v379_v22  ;;  %v2916_v21 = vpack.c.bf16 %v2524_v20, %v2523_v19 }
 0x153   : > { %v387_v24 = vsel %vm358_vm0, %v386_v23, 0.0 }
 0x154   : > { %v388_v25 = vrot.slane %v387_v24, 4 }
 0x156   : > { %v389_v26 = vadd.f32 %v388_v25, %v387_v24 }
 0x158   : > { %v390_v27 = vrot.slane %v389_v26, 2 }
 0x15a   : > { %v391_v28 = vadd.f32 %v390_v27, %v389_v26 }
 0x15c   : > { %v392_v29 = vrot.slane %v391_v28, 1 }
 0x15e   : > { %v393_v30 = vadd.f32 %v392_v29, %v391_v28 }
 0x160   : > { %v395_v31 = vmul.f32 0.125, %v393_v30 }
 0x162   : > { %2677 = vmatmul.mubr.msk.f32.vlgmr.msra.gmra.mrb[0].mxu0 %vm358_vm0, %v395_v31 }
 0x163   : > { %2703 = vmatprep.mubr.msk.f32.mxu0 %vm3083_vm1, %v3084_v13  ;;  %2890 = vmatpush3.bf16.msra.mxu0 %v2889_v41  ;;  %v2518_v41 = vld [vmem:[%s3581_s6 + $0x30] sm:$0xff] }
 0x164   : > { %2891 = vmatprep.subr.bf16.mxu0 %v3082_v10  ;;  %v2910_v43 = vpack.c.bf16 %v2519_v42, %v2518_v41  ;;  %v2550_v42 = vld [vmem:[%s3583_s8 + $0x10] sm:$0xff] }
 0x167   : > { %2893 = vmatpush3.bf16.msra.mxu0 %v2892_v47 }
 0x168   : > { %2717 = vmatprep.subr.mxu0 %v3084_v13 }
 0x235   : > { %v469_v33 = vpop.f32.mrb[0].mxu0 }
 0x236   : > { %v473_v34 = vmax.f32 %v469_v33, 0.0  ;;  %v2678_v35 = vpop.f32.mrb[1].mxu0 }
 0x238   : > { %2682 = vmatmul.mubr.msk.f32.vlgmr.msra.gmra.mrb[0].mxu1 %vm475_vm3, %v473_v34 }
 0x239   : > { %2692 = vmatprep.mubr.msk.f32.mxu1 %vm3083_vm1, %v3084_v13  ;;  %2884 = vmatpush3.bf16.msra.mxu1 %v2883_v38 }
 0x23a   : > { %2885 = vmatprep.subr.bf16.mxu1 %v3082_v10 }
 0x23d   : > { %2887 = vmatpush3.bf16.msra.mxu1 %v2886_v44 }
 0x23e   : > { %2894 = vmatprep.subr.bf16.mxu1 %v3082_v10 }
 0x30b   : > { %v549_v48 = vpop.f32.mrb[0].mxu1 }
 0x30c   : > { %v2504_v49 = vmul.f32 -1.442695, %v549_v48  ;;  %v2683_v50 = vpop.f32.mrb[1].mxu1 }
 0x30e   : > { %2998 = vpow2.f32 %v2504_v49 }
 0x318   : > { %v2999_v51 = vpop.eup %2998 }
 0x319   : > { %v556_v52 = vadd.f32 1.0, %v2999_v51 }
 0x31b   : > { %3000 = vrcp.f32 %v556_v52 }
 0x325   : > { %v3001_v58 = vpop.eup %3000 }
 0x326   : > { %v562_v59 = vrot.slane %v3001_v58, %v561_v55 }
 0x328   : > { %v3270_v61 = vmul.f32 %v562_v59, %v386_v23 }
 0x32a   : > { %2693 = vmatmul.mubr.msk.f32.vlgmr.msra.gmra.mrb[2].mxu1 %vm358_vm0, %v3270_v61  ;;  %2704 = vmatmul.mubr.msk.f32.vlgmr.msra.gmra.mrb[2].mxu0 %vm358_vm0, %v3270_v61 }
 0x32b   : > { %2896 = vmatpush3.bf16.msra.mxu1 %v2895_v60  ;;  %2714 = vmatprep.mubr.msk.f32.mxu1 %vm3083_vm1, %v3084_v13 }
 0x32c   : > { %2897 = vmatprep.subr.bf16.mxu1 %v3082_v10  ;;  %2719 = vmatprep.mubr.msk.f32.mxu0 %vm3083_vm1, %v3084_v13 }
 0x32f   : > { %2899 = vmatpush3.bf16.msra.mxu1 %v2898_v1  ;;  %v2538_v1 = vld [vmem:[%s3581_s6 + $0x48] sm:$0xff] }
 0x330   : > { %2722 = vmatprep.subr.mxu1 %v3084_v13  ;;  %v2925_v2 = vpack.c.bf16 %v2538_v1, %v2537_v63  ;;  %v2560_v63 = vld [vmem:[%s3581_s6 + $0x78] sm:$0xff] }
 0x332   : > { %2715 = vmatmul.mubr.msk.f32.vlgmr.msra.gmra.mrb[4].mxu1 %vm358_vm0, %v3270_v61 }
 0x333   : > { %2724 = vmatprep.mubr.msk.f32.mxu1 %vm3083_vm1, %v3084_v13 }
 0x3fd   : > { %v637_v4 = vpop.f32.mrb[2].mxu1  ;;  %v711_v5 = vpop.f32.mrb[2].mxu0 }
 0x3fe   : > { %v2694_v6 = vpop.f32.mrb[3].mxu1  ;;  %v2705_v7 = vpop.f32.mrb[3].mxu0  ;;  %2718 = vmatpush3.xpose.msk.msra.mxu0 %vm789_vm4, %v711_v5 }
 0x3ff   : > { %2900 = vmatprep.subr.bf16.mxu0 %v3082_v10  ;;  %v2532_v6 = vld [vmem:[%s3580_s5 + $0x40] sm:$0xff]  ;;  %v2533_v7 = vld [vmem:[%s3580_s5 + $0x48] sm:$0xff] }
 0x401   : > { %2720 = vmatmul.mubr.msk.f32.vlgmr.msra.gmra.mrb[4].mxu0 %vm789_vm4, %v637_v4  ;;  %v2540_v4 = vld [vmem:[%s3581_s6 + $0x58] sm:$0xff] }
 0x402   : > { %2902 = vmatpush3.bf16.msra.mxu0 %v2901_v8  ;;  %2735 = vmatprep.mubr.msk.f32.mxu0 %vm3083_vm1, %v3084_v13  ;;  %v2928_v5 = vpack.c.bf16 %v2540_v4, %v2539_v3  ;;  %v2919_v8 = vpack.c.bf16 %v2533_v7, %v2532_v6 }
 0x403   : > { %2903 = vmatprep.subr.bf16.mxu0 %v3082_v10 }
 0x405   : > { %v785_v16 = vpop.f32.mrb[4].mxu1 }
 0x406   : > { %v2716_v17 = vpop.f32.mrb[5].mxu1  ;;  %2723 = vmatpush3.msra.mxu1 %v785_v16  ;;  %2905 = vmatpush3.bf16.msra.mxu0 %v2904_v12  ;;  %v2542_v16 = vld [vmem:[%s3582_s7 + $0x40] sm:$0xff] }
 0x407   : > { %2912 = vmatprep.subr.bf16.mxu0 %v3082_v10  ;;  %2906 = vmatprep.subr.bf16.mxu1 %v3082_v10  ;;  %v2543_v17 = vld [vmem:[%s3582_s7 + $0x48] sm:$0xff] }
 0x408   : > { %v2931_v20 = vpack.c.bf16 %v2543_v17, %v2542_v16 }
 0x409   : > { %2736 = vmatmul.mubr.msk.f32.vlgmr.msra.gmra.mrb[6].mxu0 %vm358_vm0, %v3270_v61 }
 0x40a   : > { %2914 = vmatpush3.bf16.msra.mxu0 %v2913_v18  ;;  %2757 = vmatprep.mubr.msk.f32.mxu0 %vm3083_vm1, %v3084_v13 }
 0x40b   : > { %2915 = vmatprep.subr.bf16.mxu0 %v3082_v10 }
 0x40e   : > { %2917 = vmatpush3.bf16.msra.mxu0 %v2916_v21  ;;  %v2544_v21 = vld [vmem:[%s3582_s7 + $0x50] sm:$0xff] }
 0x40f   : > { %2770 = vmatprep.subr.mxu0 %v3084_v13 }
 0x411   : > { %2758 = vmatmul.mubr.msk.f32.vlgmr.msra.gmra.mrb[8].mxu0 %vm358_vm0, %v3270_v61 }
 0x412   : > { %2772 = vmatprep.mubr.msk.f32.mxu0 %vm3083_vm1, %v3084_v13  ;;  %2771 = vmatpush3.msra.mxu0 %v2529_v57 }
 0x413   : > { %2918 = vmatprep.subr.bf16.mxu0 %v3082_v10 }
 0x4d4   : > { %v862_v22 = vpop.f32.mrb[4].mxu0 }
 0x4d5   : > { %v866_v23 = vmul.f32 0.17677669, %v862_v22  ;;  %v2721_v24 = vpop.f32.mrb[5].mxu0  ;;  %v2545_v22 = vld [vmem:[%s3582_s7 + $0x58] sm:$0xff] }
 0x4d7   : > { %v867_v25 = vsel %vm789_vm4, %v866_v23, -inf }
 0x4d8   : > { %868 = vmax.xlane.f32.xlu1 %v867_v25 }
 0x4dc   : > { %v1023_v26 = vpop.f32.mrb[6].mxu0 }
 0x4dd   : > { %v2737_v27 = vpop.f32.mrb[7].mxu0 }
 0x4e4   : > { %v1173_v28 = vpop.f32.mrb[8].mxu0 }
 0x4e5   : > { %v2759_v29 = vpop.f32.mrb[9].mxu0 }
 0x565   : > { %v869_v30 = vpop.xlane.xlu1 %868 }
 0x566   : > { %v870_v31 = vsub.f32 %v866_v23, %v869_v30  ;;  %v2934_v23 = vpack.c.bf16 %v2545_v22, %v2544_v21  ;;  %v2570_v22 = vld [vmem:[%s3583_s8 + $0x18] sm:$0xff] }
 0x568   : > { %v871_v32 = vmul.f32 1.442695, %v870_v31 }
 0x56a   : > { %3002 = vpow2.f32 %v871_v32 }
 0x574   : > { %v3003_v33 = vpop.eup %3002 }
 0x575   : > { %v873_v34 = vsel %vm789_vm4, %v3003_v33, 0.0 }
 0x576   : > { %874 = vadd.xlane.f32.xlu1 %v873_v34 }
 0x603   : > { %v875_v35 = vpop.xlane.xlu1 %874 }
 0x604   : > { %3004 = vrcp.f32 %v875_v35 }
 0x60e   : > { %v3005_v38 = vpop.eup %3004 }
 0x60f   : > { %v877_v40 = vmul.f32 %v3005_v38, %v3003_v33 }
 0x611   : > { %2725 = vmatmul.mubr.msk.f32.vlgmr.msra.gmra.mrb[6].mxu1 %vm789_vm4, %v877_v40 }
 0x612   : > { %2908 = vmatpush3.bf16.msra.mxu1 %v2907_v39  ;;  %2746 = vmatprep.mubr.msk.f32.mxu1 %vm3083_vm1, %v3084_v13 }
 0x613   : > { %2909 = vmatprep.subr.bf16.mxu1 %v3082_v10 }
 0x616   : > { %2911 = vmatpush3.bf16.msra.mxu1 %v2910_v43 }
 0x617   : > { %2760 = vmatprep.subr.mxu1 %v3084_v13 }
 0x619   : > { %2747 = vmatmul.mubr.msk.f32.vlgmr.msra.gmra.mrb[8].mxu1 %vm358_vm0, %v3270_v61 }
 0x61a   : > { %2762 = vmatprep.mubr.msk.f32.mxu1 %vm3083_vm1, %v3084_v13 }
 0x6e4   : > { %v947_v44 = vpop.f32.mrb[6].mxu1 }
 0x6e5   : > { %v2726_v45 = vpop.f32.mrb[7].mxu1 }
 0x6e6   : > { %v2553_v45 = vld [vmem:[%s3580_s5 + $0x68] sm:$0xff] }
 0x6ec   : > { %v1098_v46 = vpop.f32.mrb[8].mxu1 }
 0x6ed   : > { %v2748_v47 = vpop.f32.mrb[9].mxu1  ;;  %2761 = vmatpush3.xpose.msk.msra.mxu1 %vm789_vm4, %v1098_v46 }
 0x6ee   : > { %2765 = vmatprep.subr.mxu1 %v3084_v13 }
 0x6f0   : > { %2763 = vmatmul.mubr.msk.f32.vlgmr.msra.gmra.mrb[10].mxu1 %vm789_vm4, %v1023_v26 }
 0x6f1   : > { %2766 = vmatpush3.msra.mxu1 %v1173_v28  ;;  %2767 = vmatprep.mubr.msk.f32.mxu1 %vm3083_vm1, %v3084_v13 }
 0x6f2   : > { %2775 = vmatprep.subr.mxu1 %v3084_v13 }
 0x7c3   : > { %v1249_v48 = vpop.f32.mrb[10].mxu1 }
 0x7c4   : > { %v1253_v49 = vmul.f32 0.17677669, %v1249_v48  ;;  %v2764_v50 = vpop.f32.mrb[11].mxu1 }
 0x7c5   : > { %v2555_v50 = vld [vmem:[%s3580_s5 + $0x78] sm:$0xff] }
 0x7c6   : > { %v1254_v51 = vsel %vm789_vm4, %v1253_v49, -inf }
 0x7c7   : > { %1255 = vmax.xlane.f32.xlu0 %v1254_v51 }
 0x854   : > { %v1256_v52 = vpop.xlane.xlu0 %1255 }
 0x855   : > { %v1257_v53 = vsub.f32 %v1253_v49, %v1256_v52  ;;  %v2554_v49 = vld [vmem:[%s3580_s5 + $0x70] sm:$0xff]  ;;  %v2562_v52 = vld [vmem:[%s3582_s7 + $0x60] sm:$0xff] }
 0x856   : > { %v2940_v51 = vpack.c.bf16 %v2555_v50, %v2554_v49 }
 0x857   : > { %v1258_v54 = vmul.f32 1.442695, %v1257_v53  ;;  %v2563_v53 = vld [vmem:[%s3582_s7 + $0x68] sm:$0xff] }
 0x859   : > { %3006 = vpow2.f32 %v1258_v54  ;;  %v2949_v54 = vpack.c.bf16 %v2563_v53, %v2562_v52 }
 0x863   : > { %v3007_v55 = vpop.eup %3006 }
 0x864   : > { %v1260_v56 = vsel %vm789_vm4, %v3007_v55, 0.0 }
 0x865   : > { %1261 = vadd.xlane.f32.xlu1 %v1260_v56  ;;  %v2565_v56 = vld [vmem:[%s3582_s7 + $0x78] sm:$0xff] }
 0x8f2   : > { %v1262_v58 = vpop.xlane.xlu1 %1261 }
 0x8f3   : > { %3008 = vrcp.f32 %v1262_v58  ;;  %v2557_v58 = vld [vmem:[%s3581_s6 + $0x60] sm:$0xff] }
 0x8fd   : > { %v3009_v59 = vpop.eup %3008 }
 0x8fe   : > { %v1264_v60 = vmul.f32 %v3009_v59, %v3007_v55  ;;  %v2564_v55 = vld [vmem:[%s3582_s7 + $0x70] sm:$0xff]  ;;  %v2558_v59 = vld [vmem:[%s3581_s6 + $0x68] sm:$0xff] }
 0x8ff   : > { %v2952_v57 = vpack.c.bf16 %v2565_v56, %v2564_v55 }
 0x900   : > { %2768 = vmatmul.mubr.msk.f32.vlgmr.msra.gmra.mrb[12].mxu1 %vm789_vm4, %v1264_v60  ;;  %v2943_v60 = vpack.c.bf16 %v2558_v59, %v2557_v58 }
 0x901   : > { %2776 = vmatpush3.msra.mxu1 %v951_v62  ;;  %2777 = vmatprep.mubr.msk.f32.mxu1 %vm3083_vm1, %v3084_v13  ;;  %v2559_v62 = vld [vmem:[%s3581_s6 + $0x70] sm:$0xff] }
 0x902   : > { %2924 = vmatprep.subr.bf16.mxu1 %v3082_v10  ;;  %v2946_v3 = vpack.c.bf16 %v2560_v63, %v2559_v62 }
 0x904   : > { %2778 = vmatmul.mubr.msk.f32.vlgmr.msra.gmra.mrb[14].mxu1 %vm789_vm4, %v947_v44  ;;  %v2552_v44 = vld [vmem:[%s3580_s5 + $0x60] sm:$0xff] }
 0x905   : > { %2926 = vmatpush3.bf16.msra.mxu1 %v2925_v2  ;;  %2799 = vmatprep.mubr.msk.f32.mxu1 %vm3083_vm1, %v3084_v13  ;;  %v2937_v47 = vpack.c.bf16 %v2553_v45, %v2552_v44 }
 0x906   : > { %2927 = vmatprep.subr.bf16.mxu1 %v3082_v10 }
 0x909   : > { %2929 = vmatpush3.bf16.msra.mxu1 %v2928_v5 }
 0x90a   : > { %2813 = vmatprep.subr.mxu1 %v3084_v13 }
 0x90c   : > { %2800 = vmatmul.mubr.msk.f32.vlgmr.msra.gmra.mrb[16].mxu1 %vm358_vm0, %v3270_v61 }
 0x90d   : > { %2815 = vmatprep.mubr.msk.f32.mxu1 %vm3083_vm1, %v3084_v13 }
 0x9d3   : > { %v1334_v12 = vpop.f32.mrb[12].mxu1 }
 0x9d4   : > { %v2769_v14 = vpop.f32.mrb[13].mxu1  ;;  %2773 = vmatmul.mubr.msk.f32.vlgmr.msra.gmra.mrb[10].mxu0 %vm789_vm4, %v1334_v12 }
 0x9d5   : > { %2920 = vmatpush3.bf16.msra.mxu0 %v2919_v8  ;;  %2788 = vmatprep.mubr.msk.f32.mxu0 %vm3083_vm1, %v3084_v13 }
 0x9d6   : > { %2921 = vmatprep.subr.bf16.mxu0 %v3082_v10 }
 0x9d7   : > { %v1482_v18 = vpop.f32.mrb[14].mxu1 }
 0x9d8   : > { %v2779_v19 = vpop.f32.mrb[15].mxu1 }
 0x9d9   : > { %2923 = vmatpush3.bf16.msra.mxu0 %v2922_v15 }
 0x9da   : > { %2930 = vmatprep.subr.bf16.mxu0 %v3082_v10 }
 0x9dc   : > { %2789 = vmatmul.mubr.msk.f32.vlgmr.msra.gmra.mrb[12].mxu0 %vm358_vm0, %v3270_v61 }
 0x9dd   : > { %2932 = vmatpush3.bf16.msra.mxu0 %v2931_v20  ;;  %2810 = vmatprep.mubr.msk.f32.mxu0 %vm3083_vm1, %v3084_v13 }
 0x9de   : > { %2933 = vmatprep.subr.bf16.mxu0 %v3082_v10 }
 0x9df   : > { %v1632_v24 = vpop.f32.mrb[16].mxu1 }
 0x9e0   : > { %v2801_v25 = vpop.f32.mrb[17].mxu1  ;;  %2814 = vmatpush3.xpose.msk.msra.mxu1 %vm789_vm4, %v1632_v24 }
 0x9e1   : > { %2935 = vmatpush3.bf16.msra.mxu0 %v2934_v23  ;;  %2818 = vmatprep.subr.mxu1 %v3084_v13 }
 0x9e2   : > { %2823 = vmatprep.subr.mxu0 %v3084_v13 }
 0x9e4   : > { %2811 = vmatmul.mubr.msk.f32.vlgmr.msra.gmra.mrb[14].mxu0 %vm358_vm0, %v3270_v61 }
 0x9e5   : > { %2825 = vmatprep.mubr.msk.f32.mxu0 %vm3083_vm1, %v3084_v13  ;;  %2824 = vmatpush3.msra.mxu0 %v2550_v42 }
 0x9e6   : > { %2942 = vmatprep.subr.bf16.mxu0 %v3082_v10 }
 0xaa7   : > { %v1409_v26 = vpop.f32.mrb[10].mxu0 }
 0xaa8   : > { %v3438_v27 = vadd.f32 %v1482_v18, %v1409_v26  ;;  %v2774_v28 = vpop.f32.mrb[11].mxu0 }
 0xaaf   : > { %v1557_v29 = vpop.f32.mrb[12].mxu0 }
 0xab0   : > { %v2790_v30 = vpop.f32.mrb[13].mxu0  ;;  %2816 = vmatmul.mubr.msk.f32.vlgmr.msra.gmra.mrb[18].mxu1 %vm789_vm4, %v1557_v29 }
 0xab1   : > { %2820 = vmatprep.mubr.msk.f32.mxu1 %vm3083_vm1, %v3084_v13  ;;  %v2572_v30 = vld [vmem:[%s3584_s9] ss:$0 sm:$0xff] }
 0xab7   : > { %v1707_v31 = vpop.f32.mrb[14].mxu0 }
 0xab8   : > { %v2812_v32 = vpop.f32.mrb[15].mxu0  ;;  %2819 = vmatpush3.msra.mxu1 %v1707_v31 }
 0xab9   : > { %2936 = vmatprep.subr.bf16.mxu1 %v3082_v10 }
 0xb83   : > { %v1783_v33 = vpop.f32.mrb[18].mxu1 }
 0xb84   : > { %v1787_v34 = vmul.f32 0.17677669, %v1783_v33  ;;  %v2817_v35 = vpop.f32.mrb[19].mxu1 }
 0xb86   : > { %v1788_v36 = vsel %vm789_vm4, %v1787_v34, -inf }
 0xb87   : > { %1789 = vmax.xlane.f32.xlu0 %v1788_v36 }
 0xc14   : > { %v1790_v37 = vpop.xlane.xlu0 %1789 }
 0xc15   : > { %v1791_v38 = vsub.f32 %v1787_v34, %v1790_v37 }
 0xc17   : > { %v1792_v39 = vmul.f32 1.442695, %v1791_v38 }
 0xc19   : > { %3010 = vpow2.f32 %v1792_v39 }
 0xc23   : > { %v3011_v40 = vpop.eup %3010 }
 0xc24   : > { %v1794_v41 = vsel %vm789_vm4, %v3011_v40, 0.0 }
 0xc25   : > { %1795 = vadd.xlane.f32.xlu1 %v1794_v41 }
 0xcb2   : > { %v1796_v43 = vpop.xlane.xlu1 %1795 }
 0xcb3   : > { %3012 = vrcp.f32 %v1796_v43 }
 0xcbd   : > { %v3013_v46 = vpop.eup %3012 }
 0xcbe   : > { %v1798_v48 = vmul.f32 %v3013_v46, %v3011_v40 }
 0xcc0   : > { %2821 = vmatmul.mubr.msk.f32.vlgmr.msra.gmra.mrb[20].mxu1 %vm789_vm4, %v1798_v48 }
 0xcc1   : > { %2938 = vmatpush3.bf16.msra.mxu1 %v2937_v47  ;;  %2836 = vmatprep.mubr.msk.f32.mxu1 %vm3083_vm1, %v3084_v13 }
 0xcc2   : > { %2939 = vmatprep.subr.bf16.mxu1 %v3082_v10 }
 0xcc5   : > { %2941 = vmatpush3.bf16.msra.mxu1 %v2940_v51 }
 0xcc6   : > { %2948 = vmatprep.subr.bf16.mxu1 %v3082_v10 }
 0xcc8   : > { %2837 = vmatmul.mubr.msk.f32.vlgmr.msra.gmra.mrb[22].mxu1 %vm358_vm0, %v3270_v61 }
 0xcc9   : > { %2950 = vmatpush3.bf16.msra.mxu1 %v2949_v54  ;;  %2858 = vmatprep.mubr.msk.f32.mxu1 %vm3083_vm1, %v3084_v13 }
 0xcca   : > { %2951 = vmatprep.subr.bf16.mxu1 %v3082_v10 }
 0xccd   : > { %2953 = vmatpush3.bf16.msra.mxu1 %v2952_v57 }
 0xcce   : > { %2871 = vmatprep.subr.mxu1 %v3084_v13 }
 0xcd0   : > { %2859 = vmatmul.mubr.msk.f32.vlgmr.msra.gmra.mrb[24].mxu1 %vm358_vm0, %v3270_v61 }
 0xcd1   : > { %2873 = vmatprep.mubr.msk.f32.mxu1 %vm3083_vm1, %v3084_v13  ;;  %2872 = vmatpush3.msra.mxu1 %v2570_v22 }
 0xd93   : > { %v1868_v1 = vpop.f32.mrb[20].mxu1 }
 0xd94   : > { %v2822_v2 = vpop.f32.mrb[21].mxu1  ;;  %2826 = vmatmul.mubr.msk.f32.vlgmr.msra.gmra.mrb[16].mxu0 %vm789_vm4, %v1868_v1 }
 0xd95   : > { %2944 = vmatpush3.bf16.msra.mxu0 %v2943_v60  ;;  %2847 = vmatprep.mubr.msk.f32.mxu0 %vm3083_vm1, %v3084_v13 }
 0xd96   : > { %2945 = vmatprep.subr.bf16.mxu0 %v3082_v10 }
 0xd99   : > { %2947 = vmatpush3.bf16.msra.mxu0 %v2946_v3 }
 0xd9a   : > { %2861 = vmatprep.subr.mxu0 %v3084_v13 }
 0xd9b   : > { %v2019_v4 = vpop.f32.mrb[22].mxu1 }
 0xd9c   : > { %v2838_v5 = vpop.f32.mrb[23].mxu1  ;;  %2848 = vmatmul.mubr.msk.f32.vlgmr.msra.gmra.mrb[18].mxu0 %vm358_vm0, %v3270_v61 }
 0xd9d   : > { %2863 = vmatprep.mubr.msk.f32.mxu0 %vm3083_vm1, %v3084_v13 }
 0xda3   : > { %v2169_v6 = vpop.f32.mrb[24].mxu1 }
 0xda4   : > { %v2860_v7 = vpop.f32.mrb[25].mxu1 }
 0xe67   : > { %v1943_v8 = vpop.f32.mrb[16].mxu0 }
 0xe68   : > { %v1947_v9 = vadd.f32 %v1943_v8, %v3438_v27  ;;  %v2827_v11 = vpop.f32.mrb[17].mxu0 }
 0xe6f   : > { %v2094_v12 = vpop.f32.mrb[18].mxu0 }
 0xe70   : > { %v2849_v14 = vpop.f32.mrb[19].mxu0  ;;  %2862 = vmatpush3.xpose.msk.msra.mxu0 %vm789_vm4, %v2094_v12 }
 0xe71   : > { %2866 = vmatprep.subr.mxu0 %v3084_v13 }
 0xe73   : > { %2864 = vmatmul.mubr.msk.f32.vlgmr.msra.gmra.mrb[20].mxu0 %vm789_vm4, %v2019_v4 }
 0xe74   : > { %2867 = vmatpush3.msra.mxu0 %v2169_v6  ;;  %2868 = vmatprep.mubr.msk.f32.mxu0 %vm3083_vm1, %v3084_v13 }
 0xf46   : > { %v2245_v10 = vpop.f32.mrb[20].mxu0 }
 0xf47   : > { %v2249_v61 = vmul.f32 0.17677669, %v2245_v10  ;;  %v2865_v15 = vpop.f32.mrb[21].mxu0 }
 0xf49   : > { %v2250_v16 = vsel %vm789_vm4, %v2249_v61, -inf }
 0xf4a   : > { %2251 = vmax.xlane.f32.xlu0 %v2250_v16 }
 0xfd7   : > { %v2252_v17 = vpop.xlane.xlu0 %2251 }
 0xfd8   : > { %v2253_v18 = vsub.f32 %v2249_v61, %v2252_v17 }
 0xfda   : > { %v2254_v19 = vmul.f32 1.442695, %v2253_v18 }
 0xfdc   : > { %3014 = vpow2.f32 %v2254_v19 }
 0xfe6   : > { %v3015_v20 = vpop.eup %3014 }
 0xfe7   : > { %v2256_v21 = vsel %vm789_vm4, %v3015_v20, 0.0 }
 0xfe8   : > { %2257 = vadd.xlane.f32.xlu1 %v2256_v21 }
0x1075   : > { %v2258_v13 = vpop.xlane.xlu1 %2257 }
0x1076   : > { %3016 = vrcp.f32 %v2258_v13 }
0x1080   : > { %v3017_v23 = vpop.eup %3016 }
0x1081   : > { %v2260_v24 = vmul.f32 %v3017_v23, %v3015_v20 }
0x1083   : > { %2869 = vmatmul.mubr.msk.f32.vlgmr.msra.gmra.mrb[22].mxu0 %vm789_vm4, %v2260_v24 }
0x1156   : > { %v2330_v25 = vpop.f32.mrb[22].mxu0 }
0x1157   : > { %v2870_v26 = vpop.f32.mrb[23].mxu0  ;;  %2874 = vmatmul.mubr.msk.f32.vlgmr.msra.gmra.mrb[26].mxu1 %vm789_vm4, %v2330_v25 }
0x122a   : > { %v2405_v27 = vpop.f32.mrb[26].mxu1 }
0x122b   : > { %v2409_v28 = vadd.f32 %v2405_v27, %v1947_v9  ;;  %v2875_v29 = vpop.f32.mrb[27].mxu1 }
0x122d   : > { %v2410_v31 = vadd.f32 %v2409_v28, %v3194_v0 }
0x122f   : > { %v2418_v32 = vadd.f32 %v2572_v30, %v2410_v31 }
0x1231   : > { %2419 = vst.msk [vmem:[%s350_s12] sm:$0xff] %vm358_vm0, %v2418_v32 }
0x1232   : > { %3031 = shalt.err (!%p3028_p3)
}
0x1233   : > { %s3032_s27 = scalar_lea.hbm %s3532_s25, 128  ;;  %s3036_s20 = scalar_lea.hbm %s3585_s10, 256 }
0x1234   : > { %p3033_p4 = scmp.ne.s32.totalorder %s3532_s25, %s3032_s27  ;;  %p3037_p9 = scmp.lt.u32.totalorder %s3532_s25, %s3585_s10 }
0x1235   : > { %p3038_p10 = scmp.lt.u32.totalorder %s3036_s20, %s3032_s27  ;;  %p3040_p12 = scmp.lt.u32.totalorder %s3032_s27, %s3532_s25 }
0x1236   : > { %p3034_p7 = pnand %p3033_p4, %p3179_p5 }
0x1237   : > { %p3039_p11 = por %p3038_p10, %p3037_p9 }
0x1238   : > { %p3035_p8 = pneg %p3034_p7 }
0x1239   : > { %p3041_p13 = por %p3040_p12, %p3039_p11 }
0x123b   : > { %p3042_p0 = pnand %p3041_p13, %p3035_p8 }
0x123d   : > { %3045 = shalt.err (!%p3042_p0)
}
0x123e   : > { %2954 = dma.vmem_to_hbm [thread:$0]  (%p3179_p5), %s3534_s18, 128, %s3532_s25, %s2421_s26  }
0x123f PF: > { %p2960_p1 = scmp.ge.s32.totalorder %s3080_s16, 2  ;;  %s2446_s29 = sand.u32 1, %s3068_s13  }
0x1240   : > { %s2447_s28 = scalar_lea.sflag [#allocation3], %s2446_s29 }
0x1241   : > { %p2957_p2 = pnand %p2960_p1, %p3183_p6 }
0x1243   : > { %3063 = dma.done.wait (!%p2957_p2), %s2447_s28, 128  }
0x1244   : > { %3065 = vsyncadd (!%p2957_p2), %s2447_s28, 4294967168  ;;  %p20_p3 = scmp.ge.s32.totalorder %s3166_s19, 4   ;;  %s3588_s13 = smov %s3072_s14 }
0x1245   : > { %s3589_s14 = smov %s3076_s15  ;;  %s3590_s15 = smov %s3177_s22 }
0x1246   : > { %s3591_s16 = smov %s3166_s19  ;;  %22 = sbr.rel (!%p20_p3) target bundleno = 3 (0x3), region = 107 }
0x124d   :  { %2452 = vsyncpa [#allocation3], 1 }
0x124e   :  { %2454 = vsyncpa [#allocation3 + $0x1], 1 }

</bundles_post_ra>
